<compile_context>
chip_gen: v7x
topology: tpu7x:2x2x1
jax: 0.10.0
libtpu: 0.0.40
codegen_flags: <defaults>
</compile_context>

<pallas_src>
import math

import jax
import jax.numpy as jnp
from jax.experimental import pallas as pl
from jax.experimental.pallas import tpu as pltpu


_HALF_LOG_2PI = 0.5 * math.log(2.0 * math.pi)


def _round_up(x, m):
    return ((x + m - 1) // m) * m


def _model_action_kernel(state_t_ref, w1t_ref, b1_ref, wht_ref, bh_ref, eps_ref,
                         out_ref):
    # fc_state: hT = relu(W1.T @ stateT + b1)            -> (128, TILE_B)
    h = jnp.dot(w1t_ref[...], state_t_ref[...],
                preferred_element_type=jnp.float32)
    h = jnp.maximum(h + b1_ref[...], 0.0)

    # Fused heads: [miu; pre_std] = W_heads.T @ hT + b    -> (2, TILE_B)
    heads = jnp.dot(wht_ref[...], h,
                    preferred_element_type=jnp.float32) + bh_ref[...]
    miu = heads[0:1, :]                                   # (1, TILE_B)
    pre_std = heads[1:2, :]                               # (1, TILE_B)

    # Softplus (PyTorch default beta=1, threshold=20).
    std = jnp.where(pre_std > 20.0, pre_std, jnp.log1p(jnp.exp(pre_std)))

    # Normal(miu, std).rsample() == miu + std * eps, eps ~ N(0,1)
    eps = eps_ref[...]                                    # (1, TILE_B)
    sample = miu + std * eps
    action = jnp.tanh(sample)

    # log_prob(sample): z = (sample - miu)/std == eps exactly.
    log_prob = -0.5 * eps * eps - jnp.log(std) - _HALF_LOG_2PI

    # entropy = -log( exp(log_prob) / (1 - tanh(action)^2 + 1e-7) )
    #         = -log_prob + log(1 - tanh(action)^2 + 1e-7)
    # (matches PyTorch: tanh applied to the already-tanh'd action)
    denom = 1.0 - jnp.tanh(action) ** 2 + 1e-07
    entropy = jnp.log(denom) - log_prob

    # Fused lane-dense output slab: row 0 = action*2, row 1 = entropy.
    out_ref[...] = jnp.concatenate([action * 2.0, entropy], axis=0)


def model_action_forward(state, params, eps):
    """state: (B, 4) f32, eps: (B, 1) f32 standard-normal noise.

    Returns (action, entropy), each (B, 1) float32.
    """
    B = state.shape[0]
    w1, b1, wm, bm, ws, bs = params

    # Transpose / fuse the tiny weights on the host side of the kernel.
    w1t = jnp.asarray(w1).T                               # (128, 4)
    b1c = jnp.asarray(b1).reshape(128, 1)                 # (128, 1)
    wht = jnp.concatenate([wm, ws], axis=1).T             # (2, 128)
    bh = jnp.concatenate([bm.reshape(1, 1), bs.reshape(1, 1)], axis=0)  # (2, 1)

    # Lane-aligned batch tile (multiple of 128). Per-tile working set is only
    # ~7 * tile_b * 4 bytes, so even tile_b=2048 (~56 KiB, double-buffered)
    # sits far below the v7x 64 MiB / 32 MiB-scoped VMEM budget while
    # amortizing per-grid-step overhead for large batches.
    tile_b = min(2048, _round_up(B, 128))
    b_pad = _round_up(B, tile_b)
    pad = b_pad - B

    state_t = jnp.pad(state.T.astype(jnp.float32), ((0, 0), (0, pad)))   # (4, Bp)
    eps_t = jnp.pad(eps.T.astype(jnp.float32), ((0, 0), (0, pad)))       # (1, Bp)

    grid = (b_pad // tile_b,)

    out_t = pl.pallas_call(
        _model_action_kernel,
        out_shape=jax.ShapeDtypeStruct((2, b_pad), jnp.float32),
        grid_spec=pltpu.PrefetchScalarGridSpec(
            num_scalar_prefetch=0,
            grid=grid,
            in_specs=[
                pl.BlockSpec((4, tile_b), lambda i: (0, i)),    # stateT (tiled)
                pl.BlockSpec((128, 4), lambda i: (0, 0)),       # W1.T   (resident)
                pl.BlockSpec((128, 1), lambda i: (0, 0)),       # b1     (resident)
                pl.BlockSpec((2, 128), lambda i: (0, 0)),       # Wheads (resident)
                pl.BlockSpec((2, 1), lambda i: (0, 0)),         # bheads (resident)
                pl.BlockSpec((1, tile_b), lambda i: (0, i)),    # epsT   (tiled)
            ],
            out_specs=pl.BlockSpec((2, tile_b), lambda i: (0, i)),  # [action; entropy]
        ),
        compiler_params=pltpu.CompilerParams(
            dimension_semantics=("parallel",),
        ),
    )(state_t, w1t, b1c, wht, bh, eps_t)

    action = out_t[0:1, :B].T                             # (B, 1)
    entropy = out_t[1:2, :B].T                            # (B, 1)
    return action, entropy


def init_params(key):
    """Deterministic init mimicking torch.nn.Linear: U(-1/sqrt(fan_in), ...)."""
    k1, k2, k3, k4, k5, k6 = jax.random.split(key, 6)
    bnd1 = 1.0 / math.sqrt(4.0)
    bnd2 = 1.0 / math.sqrt(128.0)
    w1 = jax.random.uniform(k1, (4, 128), jnp.float32, -bnd1, bnd1)
    b1 = jax.random.uniform(k2, (1, 128), jnp.float32, -bnd1, bnd1)
    wm = jax.random.uniform(k3, (128, 1), jnp.float32, -bnd2, bnd2)
    bm = jax.random.uniform(k4, (1, 1), jnp.float32, -bnd2, bnd2)
    ws = jax.random.uniform(k5, (128, 1), jnp.float32, -bnd2, bnd2)
    bs = jax.random.uniform(k6, (1, 1), jnp.float32, -bnd2, bnd2)
    return (w1, b1, wm, bm, ws, bs)


def _reference_forward(state, params, eps):
    """Pure-JAX reference mirroring the PyTorch formulas literally."""
    w1, b1, wm, bm, ws, bs = params
    h = jnp.maximum(state @ w1 + b1, 0.0)
    miu = h @ wm + bm
    pre_std = h @ ws + bs
    std = jnp.where(pre_std > 20.0, pre_std, jnp.log1p(jnp.exp(pre_std)))
    sample = miu + std * eps
    action = jnp.tanh(sample)
    z = (sample - miu) / std
    log_prob = -0.5 * z * z - jnp.log(std) - _HALF_LOG_2PI
    prob = jnp.exp(log_prob)
    entropy = prob / (1.0 - jnp.tanh(action) ** 2 + 1e-07)
    entropy = -jnp.log(entropy)
    return action * 2.0, entropy


if __name__ == "__main__":
    key = jax.random.PRNGKey(0)
    k_params, k_state, k_eps = jax.random.split(key, 3)

    B = 8
    params = init_params(k_params)
    state = jax.random.normal(k_state, (B, 4), dtype=jnp.float32)
    # rsample noise generated deterministically in glue code
    eps = jax.random.normal(k_eps, (B, 1), dtype=jnp.float32)

    action, entropy = model_action_forward(state, params, eps)
    jax.block_until_ready((action, entropy))

    assert action.shape == (B, 1) and entropy.shape == (B, 1)
    assert bool(jnp.all(jnp.isfinite(action))) and bool(jnp.all(jnp.isfinite(entropy)))

    ref_action, ref_entropy = _reference_forward(state, params, eps)
    assert bool(jnp.allclose(action, ref_action, atol=1e-4, rtol=1e-4))
    assert bool(jnp.allclose(entropy, ref_entropy, atol=1e-4, rtol=1e-4))

    print("KERNEL_OK")
</pallas_src>

<mosaic_0001>
module attributes {stable_mosaic.version = 11 : i64} {
  func.func @_model_action_kernel(%arg0: i32, %arg1: memref<4x128xf32, #tpu.memory_space<vmem>>, %arg2: memref<128x4xf32, #tpu.memory_space<vmem>>, %arg3: memref<128x1xf32, #tpu.memory_space<vmem>>, %arg4: memref<2x128xf32, #tpu.memory_space<vmem>>, %arg5: memref<2x1xf32, #tpu.memory_space<vmem>>, %arg6: memref<1x128xf32, #tpu.memory_space<vmem>>, %arg7: memref<2x128xf32, #tpu.memory_space<vmem>>) attributes {dimension_semantics = [#tpu.dimension_semantics<parallel>], iteration_bounds = array<i64: 1>, scalar_prefetch = 0 : i64, scratch_operands = 0 : i64, tpu.core_type = #tpu.core_type<tc>, window_params = [{transform_indices = @transform_0, window_bounds = array<i64: 4, 128>}, {pipeline_mode = #tpu.pipeline_mode<synchronous>, transform_indices = @transform_1, window_bounds = array<i64: 128, 4>}, {pipeline_mode = #tpu.pipeline_mode<synchronous>, transform_indices = @transform_2, window_bounds = array<i64: 128, 1>}, {pipeline_mode = #tpu.pipeline_mode<synchronous>, transform_indices = @transform_3, window_bounds = array<i64: 2, 128>}, {pipeline_mode = #tpu.pipeline_mode<synchronous>, transform_indices = @transform_4, window_bounds = array<i64: 2, 1>}, {transform_indices = @transform_5, window_bounds = array<i64: 1, 128>}, {transform_indices = @transform_6, window_bounds = array<i64: 2, 128>}]} {
    %c0 = arith.constant 0 : index
    %c0_0 = arith.constant 0 : index
    %0 = vector.load %arg2[%c0, %c0_0] : memref<128x4xf32, #tpu.memory_space<vmem>>, vector<128x4xf32>
    %c0_1 = arith.constant 0 : index
    %c0_2 = arith.constant 0 : index
    %1 = vector.load %arg1[%c0_1, %c0_2] : memref<4x128xf32, #tpu.memory_space<vmem>>, vector<4x128xf32>
    %cst = arith.constant dense<0.000000e+00> : vector<128x128xf32>
    %2 = tpu.matmul %0, %1, %cst {dimension_numbers = #tpu.dot_dimension_numbers<[1], [0], [0], [1], [0, 0, 1, 1], [], []>} : vector<128x4xf32>, vector<4x128xf32>, vector<128x128xf32> -> vector<128x128xf32>
    %c0_3 = arith.constant 0 : index
    %c0_4 = arith.constant 0 : index
    %3 = vector.load %arg3[%c0_3, %c0_4] : memref<128x1xf32, #tpu.memory_space<vmem>>, vector<128x1xf32>
    %4 = vector.broadcast %3 : vector<128x1xf32> to vector<128x128xf32>
    %5 = arith.addf %2, %4 : vector<128x128xf32>
    %cst_5 = arith.constant 0.000000e+00 : f32
    %6 = vector.broadcast %cst_5 : f32 to vector<128x128xf32>
    %7 = arith.maximumf %5, %6 : vector<128x128xf32>
    %c0_6 = arith.constant 0 : index
    %c0_7 = arith.constant 0 : index
    %8 = vector.load %arg4[%c0_6, %c0_7] : memref<2x128xf32, #tpu.memory_space<vmem>>, vector<2x128xf32>
    %cst_8 = arith.constant dense<0.000000e+00> : vector<2x128xf32>
    %9 = tpu.matmul %8, %7, %cst_8 {dimension_numbers = #tpu.dot_dimension_numbers<[1], [0], [0], [1], [0, 0, 1, 1], [], []>} : vector<2x128xf32>, vector<128x128xf32>, vector<2x128xf32> -> vector<2x128xf32>
    %c0_9 = arith.constant 0 : index
    %c0_10 = arith.constant 0 : index
    %10 = vector.load %arg5[%c0_9, %c0_10] : memref<2x1xf32, #tpu.memory_space<vmem>>, vector<2x1xf32>
    %11 = vector.broadcast %10 : vector<2x1xf32> to vector<2x128xf32>
    %12 = arith.addf %9, %11 : vector<2x128xf32>
    %13 = vector.extract_strided_slice %12 {offsets = [0, 0], sizes = [1, 128], strides = [1, 1]} : vector<2x128xf32> to vector<1x128xf32>
    %14 = vector.extract_strided_slice %12 {offsets = [1, 0], sizes = [1, 128], strides = [1, 1]} : vector<2x128xf32> to vector<1x128xf32>
    %cst_11 = arith.constant 2.000000e+01 : f32
    %15 = vector.broadcast %cst_11 : f32 to vector<1x128xf32>
    %16 = arith.cmpf ogt, %14, %15 : vector<1x128xf32>
    %17 = math.exp %14 : vector<1x128xf32>
    %18 = math.log1p %17 : vector<1x128xf32>
    %19 = arith.select %16, %14, %18 : vector<1x128xi1>, vector<1x128xf32>
    %c0_12 = arith.constant 0 : index
    %c0_13 = arith.constant 0 : index
    %20 = vector.load %arg6[%c0_12, %c0_13] : memref<1x128xf32, #tpu.memory_space<vmem>>, vector<1x128xf32>
    %21 = arith.mulf %19, %20 : vector<1x128xf32>
    %22 = arith.addf %13, %21 : vector<1x128xf32>
    %23 = math.tanh %22 : vector<1x128xf32>
    %cst_14 = arith.constant -5.000000e-01 : f32
    %24 = vector.broadcast %cst_14 : f32 to vector<1x128xf32>
    %25 = arith.mulf %24, %20 : vector<1x128xf32>
    %26 = arith.mulf %25, %20 : vector<1x128xf32>
    %27 = math.log %19 : vector<1x128xf32>
    %28 = arith.subf %26, %27 : vector<1x128xf32>
    %cst_15 = arith.constant 0.918938517 : f32
    %29 = vector.broadcast %cst_15 : f32 to vector<1x128xf32>
    %30 = arith.subf %28, %29 : vector<1x128xf32>
    %31 = math.tanh %23 : vector<1x128xf32>
    %32 = arith.mulf %31, %31 : vector<1x128xf32>
    %cst_16 = arith.constant 1.000000e+00 : f32
    %33 = vector.broadcast %cst_16 : f32 to vector<1x128xf32>
    %34 = arith.subf %33, %32 : vector<1x128xf32>
    %cst_17 = arith.constant 1.000000e-07 : f32
    %35 = vector.broadcast %cst_17 : f32 to vector<1x128xf32>
    %36 = arith.addf %34, %35 : vector<1x128xf32>
    %37 = math.log %36 : vector<1x128xf32>
    %38 = arith.subf %37, %30 : vector<1x128xf32>
    %cst_18 = arith.constant 2.000000e+00 : f32
    %39 = vector.broadcast %cst_18 : f32 to vector<1x128xf32>
    %40 = arith.mulf %23, %39 : vector<1x128xf32>
    %41 = tpu.concatenate %40, %38 in 0 : vector<1x128xf32>, vector<1x128xf32> -> vector<2x128xf32>
    %c0_19 = arith.constant 0 : index
    %c0_20 = arith.constant 0 : index
    %42 = vector.load %arg7[%c0_19, %c0_20] : memref<2x128xf32, #tpu.memory_space<vmem>>, vector<2x128xf32>
    tpu.vector_store %arg7[%c0_19, %c0_20], %41 {strides = array<i32>} : memref<2x128xf32, #tpu.memory_space<vmem>>, vector<2x128xf32>,
    return
  }
  func.func @transform_0(%arg0: i32) -> (i32, i32) {
    %c0_i32 = arith.constant 0 : i32
    %c0_i32_0 = arith.constant 0 : i32
    return %c0_i32, %arg0 : i32, i32
  }
  func.func @transform_1(%arg0: i32) -> (i32, i32) {
    %c0_i32 = arith.constant 0 : i32
    %c0_i32_0 = arith.constant 0 : i32
    %c0_i32_1 = arith.constant 0 : i32
    return %c0_i32, %c0_i32_0 : i32, i32
  }
  func.func @transform_2(%arg0: i32) -> (i32, i32) {
    %c0_i32 = arith.constant 0 : i32
    %c0_i32_0 = arith.constant 0 : i32
    %c0_i32_1 = arith.constant 0 : i32
    return %c0_i32, %c0_i32_0 : i32, i32
  }
  func.func @transform_3(%arg0: i32) -> (i32, i32) {
    %c0_i32 = arith.constant 0 : i32
    %c0_i32_0 = arith.constant 0 : i32
    %c0_i32_1 = arith.constant 0 : i32
    return %c0_i32, %c0_i32_0 : i32, i32
  }
  func.func @transform_4(%arg0: i32) -> (i32, i32) {
    %c0_i32 = arith.constant 0 : i32
    %c0_i32_0 = arith.constant 0 : i32
    %c0_i32_1 = arith.constant 0 : i32
    return %c0_i32, %c0_i32_0 : i32, i32
  }
  func.func @transform_5(%arg0: i32) -> (i32, i32) {
    %c0_i32 = arith.constant 0 : i32
    %c0_i32_0 = arith.constant 0 : i32
    return %c0_i32, %arg0 : i32, i32
  }
  func.func @transform_6(%arg0: i32) -> (i32, i32) {
    %c0_i32 = arith.constant 0 : i32
    %c0_i32_0 = arith.constant 0 : i32
    return %c0_i32, %arg0 : i32, i32
  }
}

</mosaic_0001>

<bundles_post_ra>
// kernel: tpu_custom_call.1
= control target key start
LH: loop header
LB: loop body
LE: loop exit
PB: predicated region body
PF: predicated region fallthrough
CT: control target
= control target key end

     0   :  { %vm186_vm0 = vcmask 1043456   ;;  %vm137_vm1 = vcmask 31744   ;;  %v686_v4 = vmov 0   ;;  %s871_s0 = inlined_call_operand.vmem [shape: f32[4,128], index: 0, kind: input, shape index: {}]   ;;  %s872_s1 = inlined_call_operand.vmem [shape: f32[128,4], index: 1, kind: input, shape index: {}]   ;;  %s873_s2 = inlined_call_operand.vmem [shape: f32[128,1], index: 2, kind: input, shape index: {}]   ;;  %s874_s3 = inlined_call_operand.vmem [shape: f32[2,128], index: 3, kind: input, shape index: {}]   ;;  %s875_s4 = inlined_call_operand.vmem [shape: f32[2,1], index: 4, kind: input, shape index: {}]   ;;  %s876_s5 = inlined_call_operand.vmem [shape: f32[1,128], index: 5, kind: input, shape index: {}]   ;;  %s877_s6 = inlined_call_operand.hbm [shape: f32[2,128], index: 6, kind: output, shape index: {}]  }
   0x1   :  { %v40_v0 = vld [vmem:[%s871_s0] sm:$0xf]  ;;  %v25_v2 = vld [vmem:[%s872_s1 + $0x8] sm:$0xff]  ;;  %v26_v3 = vld [vmem:[%s872_s1 + $0x10] sm:$0xff]  ;;  %648 = vset.pattern.permute.xlu0 %v686_v4  ;;  %649 = vset.pattern.permute.xlu1 %v686_v4 }
   0x2   :  { %v24_v1 = vld [vmem:[%s872_s1] sm:$0xff]  ;;  %557 = vmatprep.subr.msk.mxu0 %vm186_vm0, %v40_v0  ;;  %v27_v5 = vld [vmem:[%s872_s1 + $0x18] sm:$0xff]  ;;  %v43_v8 = vld [vmem:[%s873_s2 + $0x10] sm:$0xff] }
   0x3   :  { %559 = vmatprep.mubr.msk.f32.mxu0 %vm137_vm1, %v24_v1  ;;  %558 = vmatpush3.msk.msra.mxu0 %vm186_vm0, %v40_v0  ;;  %v28_v6 = vld [vmem:[%s872_s1 + $0x20] sm:$0xff]  ;;  %v42_v9 = vld [vmem:[%s873_s2 + $0x8] sm:$0xff]  ;;  %v44_v11 = vld [vmem:[%s873_s2 + $0x18] sm:$0xff] }
   0x4   :  { %560 = vmatmul.mubr.msk.f32.vlgmr.msra.gmra.mrb[0].mxu0 %vm137_vm1, %v25_v2  ;;  %v41_v7 = vld [vmem:[%s873_s2] sm:$0xff]  ;;  %69 = vperm.xlu1 %649, %v43_v8   ;;  %v29_v10 = vld [vmem:[%s872_s1 + $0x28] sm:$0xff]  ;;  %v30_v12 = vld [vmem:[%s872_s1 + $0x30] sm:$0xff] }
   0x5   :  { %562 = vmatprep.mubr.msk.f32.mxu0 %vm137_vm1, %v26_v3  ;;  %59 = vperm.xlu0 %648, %v41_v7   ;;  %v45_v13 = vld [vmem:[%s873_s2 + $0x20] sm:$0xff] }
   0x8   :  { %563 = vmatmul.mubr.msk.f32.gmra.mrb[2].mxu0 %vm137_vm1, %v27_v5  ;;  %74 = vperm.xlu1 %649, %v44_v11  }
   0x9   :  { %565 = vmatprep.mubr.msk.f32.mxu0 %vm137_vm1, %v28_v6  ;;  %64 = vperm.xlu0 %648, %v42_v9  }
   0xc   :  { %566 = vmatmul.mubr.msk.f32.gmra.mrb[4].mxu0 %vm137_vm1, %v29_v10 }
   0xd   :  { %11 = vsyncpa [#allocation3], 0  ;;  %568 = vmatprep.mubr.msk.f32.mxu0 %vm137_vm1, %v30_v12  ;;  %v31_v14 = vld [vmem:[%s872_s1 + $0x38] sm:$0xff]  ;;  %v46_v15 = vld [vmem:[%s873_s2 + $0x28] sm:$0xff]  ;;  %79 = vperm.xlu0 %648, %v45_v13   ;;  %v687_v35 = vmov 0.0|0.0   ;;  %vm688_vm2 = vmmov 0  }
   0xe   :  { %v32_v16 = vld [vmem:[%s872_s1 + $0x40] sm:$0xff]  ;;  %v47_v17 = vld [vmem:[%s873_s2 + $0x30] sm:$0xff]  ;;  %84 = vperm.xlu1 %649, %v46_v15   ;;  %v33_v18 = vld [vmem:[%s872_s1 + $0x48] sm:$0xff]  ;;  %618 = vmatprep.subr.bf16.mxu1 %v687_v35  ;;  %v689_v36 = vmov 0.0   ;;  %vm488_vm5 = vcmask 1040384  }
   0xf   :  { %v48_v19 = vld [vmem:[%s873_s2 + $0x38] sm:$0xff]  ;;  %v34_v20 = vld [vmem:[%s872_s1 + $0x50] sm:$0xff]  ;;  %v49_v21 = vld [vmem:[%s873_s2 + $0x40] sm:$0xff]  ;;  %615 = vmatprep.mubr.msk.f32.mxu1 %vm688_vm2, %v689_v36 }
  0x10   :  { %569 = vmatmul.mubr.msk.f32.gmra.mrb[6].mxu0 %vm137_vm1, %v31_v14  ;;  %v35_v22 = vld [vmem:[%s872_s1 + $0x58] sm:$0xff]  ;;  %v50_v23 = vld [vmem:[%s873_s2 + $0x48] sm:$0xff]  ;;  %v36_v24 = vld [vmem:[%s872_s1 + $0x60] sm:$0xff] }
  0x11   :  { %571 = vmatprep.mubr.msk.f32.mxu0 %vm137_vm1, %v32_v16  ;;  %89 = vperm.xlu0 %648, %v47_v17   ;;  %v51_v25 = vld [vmem:[%s873_s2 + $0x50] sm:$0xff]  ;;  %v37_v26 = vld [vmem:[%s872_s1 + $0x68] sm:$0xff]  ;;  %v52_v27 = vld [vmem:[%s873_s2 + $0x58] sm:$0xff] }
  0x12   :  { %94 = vperm.xlu1 %649, %v48_v19   ;;  %v38_v28 = vld [vmem:[%s872_s1 + $0x70] sm:$0xff]  ;;  %v53_v29 = vld [vmem:[%s873_s2 + $0x60] sm:$0xff]  ;;  %v39_v30 = vld [vmem:[%s872_s1 + $0x78] sm:$0xff] }
  0x13   :  { %v54_v31 = vld [vmem:[%s873_s2 + $0x68] sm:$0xff]  ;;  %v55_v32 = vld [vmem:[%s873_s2 + $0x70] sm:$0xff]  ;;  %v56_v33 = vld [vmem:[%s873_s2 + $0x78] sm:$0xff] }
  0x14   :  { %572 = vmatmul.mubr.msk.f32.gmra.mrb[8].mxu0 %vm137_vm1, %v33_v18  ;;  %v352_v34 = vld [vmem:[%s875_s4] sm:$0x3] }
  0x15   :  { %574 = vmatprep.mubr.msk.f32.mxu0 %vm137_vm1, %v34_v20  ;;  %99 = vperm.xlu0 %648, %v49_v21  }
  0x16   :  { %104 = vperm.xlu1 %649, %v50_v23  }
  0x18   :  { %575 = vmatmul.mubr.msk.f32.gmra.mrb[10].mxu0 %vm137_vm1, %v35_v22 }
  0x19   :  { %577 = vmatprep.mubr.msk.f32.mxu0 %vm137_vm1, %v36_v24  ;;  %109 = vperm.xlu0 %648, %v51_v25  }
  0x1a   :  { %114 = vperm.xlu1 %649, %v52_v27  }
  0x1c   :  { %578 = vmatmul.mubr.msk.f32.gmra.mrb[12].mxu0 %vm137_vm1, %v37_v26 }
  0x1d   :  { %580 = vmatprep.mubr.msk.f32.mxu0 %vm137_vm1, %v38_v28  ;;  %119 = vperm.xlu0 %648, %v53_v29  }
  0x1e   :  { %124 = vperm.xlu1 %649, %v54_v31  }
  0x20   :  { %581 = vmatmul.mubr.msk.f32.gmra.mrb[14].mxu0 %vm137_vm1, %v39_v30 }
  0x21   :  { %129 = vperm.xlu0 %648, %v55_v32  }
  0x22   :  { %134 = vperm.xlu1 %649, %v56_v33  }
  0x25   :  { %355 = vperm.xlu0 %648, %v352_v34  }
  0x83   :  { %v70_v37 = vpop.permute.xlu1 %69 }
  0x84   :  { %v60_v38 = vpop.permute.xlu0 %59 }
  0x87   :  { %v75_v39 = vpop.permute.xlu1 %74 }
  0x88   :  { %v65_v40 = vpop.permute.xlu0 %64 }
  0x8c   :  { %v80_v42 = vpop.permute.xlu0 %79 }
  0x8d   :  { %v85_v41 = vpop.permute.xlu1 %84 }
  0x90   :  { %v90_v51 = vpop.permute.xlu0 %89 }
  0x91   :  { %v95_v48 = vpop.permute.xlu1 %94 }
  0x94   :  { %v100_v0 = vpop.permute.xlu0 %99 }
  0x95   :  { %v105_v61 = vpop.permute.xlu1 %104 }
  0x98   :  { %v110_v12 = vpop.permute.xlu0 %109 }
  0x99   :  { %v115_v9 = vpop.permute.xlu1 %114 }
  0x9c   :  { %v120_v25 = vpop.permute.xlu0 %119 }
  0x9d   :  { %v125_v22 = vpop.permute.xlu1 %124 }
  0xa1   :  { %v135_v34 = vpop.permute.xlu1 %134 }
  0xd7   :  { %v561_v43 = vpop.f32.mrb[0].mxu0 }
  0xd8   :  { %v262_v44 = vadd.f32 %v561_v43, %v65_v40  ;;  %v256_v45 = vpop.f32.mrb[1].mxu0 }
  0xd9   :  { %v257_v46 = vadd.f32 %v256_v45, %v60_v38  ;;  %v130_v38 = vpop.permute.xlu0 %129 }
  0xda   :  { %v336_v47 = vmax.f32 %v262_v44, 0.0 }
  0xdb   :  { %v335_v49 = vmax.f32 %v257_v46, 0.0  ;;  %v564_v50 = vpop.f32.mrb[2].mxu0  ;;  %v351_v46 = vld [vmem:[%s874_s3] sm:$0x3]  ;;  %s691_s3 = smov [#allocation2]  }
  0xdc   :  { %v272_v52 = vadd.f32 %v564_v50, %v75_v39  ;;  %v266_v53 = vpop.f32.mrb[3].mxu0 }
  0xdd   :  { %v267_v54 = vadd.f32 %v266_v53, %v70_v37  ;;  %v619_v55 = vpack.c.bf16 %v336_v47, %v335_v49  ;;  %v356_v47 = vpop.permute.xlu0 %355 }
  0xde   :  { %v338_v56 = vmax.f32 %v272_v52, 0.0 }
  0xdf   :  { %v337_v57 = vmax.f32 %v267_v54, 0.0  ;;  %v567_v58 = vpop.f32.mrb[4].mxu0  ;;  %620 = vmatpush3.bf16.msra.mxu1 %v619_v55  ;;  %v443_v54 = vlaneseq }
  0xe0   :  { %v282_v59 = vadd.f32 %v567_v58, %v85_v41  ;;  %v276_v60 = vpop.f32.mrb[5].mxu0  ;;  %621 = vmatprep.subr.bf16.mxu1 %v687_v35 }
  0xe1   :  { %v622_v62 = vpack.c.bf16 %v338_v56, %v337_v57  ;;  %v277_v63 = vadd.f32 %v276_v60, %v80_v42  ;;  %v444_v56 = vshrl.u32 %v443_v54, 7 }
  0xe2   :  { %v340_v1 = vmax.f32 %v282_v59, 0.0  ;;  %v441_v59 = vld [vmem:[%s876_s5] sm:$0x1]  ;;  %s497_s5 = sshll.u32 %s691_s3, 4  ;;  %s498_s5 = int_to_ptr.vmem [resolvable:$true] %s497_s5 }
  0xe3   :  { %v339_v2 = vmax.f32 %v277_v63, 0.0  ;;  %v570_v3 = vpop.f32.mrb[6].mxu0  ;;  %623 = vmatpush3.bf16.msra.mxu1 %v622_v62  ;;  %v445_v57 = vsub.s32 0, %v444_v56  ;;  %s662_s15 = scalar_lea.vmem %s498_s5, 32  ;;  %p667_p1 = scmp.lt.s32.totalorder %s498_s5, %s498_s5 }
  0xe4   :  { %v292_v4 = vadd.f32 %v570_v3, %v95_v48  ;;  %v286_v5 = vpop.f32.mrb[7].mxu0  ;;  %624 = vmatprep.subr.bf16.mxu1 %v687_v35  ;;  %p663_p0 = scmp.ne.s32.totalorder %s498_s5, %s662_s15  ;;  %p668_p2 = scmp.lt.s32.totalorder %s662_s15, %s662_s15 }
  0xe5   :  { %v625_v6 = vpack.c.bf16 %v340_v1, %v339_v2  ;;  %v287_v7 = vadd.f32 %v286_v5, %v90_v51  ;;  %v446_v63 = vrot.slane %v441_v59, %v445_v57 }
  0xe6   :  { %v342_v8 = vmax.f32 %v292_v4, 0.0  ;;  %p669_p3 = por %p668_p2, %p667_p1 }
  0xe7   :  { %v341_v10 = vmax.f32 %v287_v7, 0.0  ;;  %v573_v11 = vpop.f32.mrb[8].mxu0  ;;  %626 = vmatpush3.bf16.msra.mxu1 %v625_v6  ;;  %v690_v6 = vmov 1966171168  }
  0xe8   :  { %v302_v13 = vadd.f32 %v573_v11, %v105_v61  ;;  %v296_v14 = vpop.f32.mrb[9].mxu0  ;;  %627 = vmatprep.subr.bf16.mxu1 %v687_v35  ;;  %v460_v7 = vunpack.c.l.s4 %v690_v6  ;;  %p670_p4 = pnand %p669_p3, %p663_p0 }
  0xe9   :  { %v628_v15 = vpack.c.bf16 %v342_v8, %v341_v10  ;;  %v297_v16 = vadd.f32 %v296_v14, %v100_v0 }
  0xea   :  { %v344_v17 = vmax.f32 %v302_v13, 0.0  ;;  %v461_v8 = vunpack.c.0.s8 %v460_v7 }
  0xeb   :  { %v343_v18 = vmax.f32 %v297_v16, 0.0  ;;  %v576_v19 = vpop.f32.mrb[10].mxu0  ;;  %629 = vmatpush3.bf16.msra.mxu1 %v628_v15 }
  0xec   :  { %v312_v20 = vadd.f32 %v576_v19, %v115_v9  ;;  %v306_v21 = vpop.f32.mrb[11].mxu0  ;;  %630 = vmatprep.subr.bf16.mxu1 %v687_v35  ;;  %v464_v11 = vsub.s32 %v461_v8, %v444_v56 }
  0xed   :  { %v631_v23 = vpack.c.bf16 %v344_v17, %v343_v18  ;;  %v307_v24 = vadd.f32 %v306_v21, %v110_v12  ;;  %v454_v17 = vmul.f32 -0.5, %v441_v59 }
  0xee   :  { %v346_v26 = vmax.f32 %v312_v20, 0.0 }
  0xef   :  { %v345_v27 = vmax.f32 %v307_v24, 0.0  ;;  %v579_v28 = vpop.f32.mrb[12].mxu0  ;;  %632 = vmatpush3.bf16.msra.mxu1 %v631_v23  ;;  %v455_v19 = vmul.f32 %v454_v17, %v441_v59 }
  0xf0   :  { %v322_v29 = vadd.f32 %v579_v28, %v125_v22  ;;  %v316_v30 = vpop.f32.mrb[13].mxu0  ;;  %633 = vmatprep.subr.bf16.mxu1 %v687_v35 }
  0xf1   :  { %v634_v31 = vpack.c.bf16 %v346_v26, %v345_v27  ;;  %v317_v32 = vadd.f32 %v316_v30, %v120_v25 }
  0xf2   :  { %v348_v33 = vmax.f32 %v322_v29, 0.0 }
  0xf3   :  { %v347_v36 = vmax.f32 %v317_v32, 0.0  ;;  %v582_v37 = vpop.f32.mrb[14].mxu0  ;;  %635 = vmatpush3.bf16.msra.mxu1 %v634_v31 }
  0xf4   :  { %v332_v39 = vadd.f32 %v582_v37, %v135_v34  ;;  %v326_v40 = vpop.f32.mrb[15].mxu0  ;;  %636 = vmatprep.subr.bf16.mxu1 %v687_v35 }
  0xf5   :  { %v637_v41 = vpack.c.bf16 %v348_v33, %v347_v36  ;;  %v327_v42 = vadd.f32 %v326_v40, %v130_v38 }
  0xf6   :  { %v350_v43 = vmax.f32 %v332_v39, 0.0 }
  0xf7   :  { %v349_v44 = vmax.f32 %v327_v42, 0.0  ;;  %638 = vmatpush3.bf16.msra.mxu1 %v637_v41 }
  0xf8   :  { %639 = vmatprep.subr.bf16.mxu1 %v687_v35 }
  0xf9   :  { %v640_v45 = vpack.c.bf16 %v350_v43, %v349_v44 }
  0xfb   :  { %641 = vmatpush3.bf16.msra.mxu1 %v640_v45 }
  0xfe   :  { %616 = vmatmul.mubr.f32.vlgmr.msra.gmra.mrb[0].mxu1 %v351_v46 }
 0x1d1   :  { %v424_v48 = vpop.f32.mrb[0].mxu1 }
 0x1d2   :  { %v425_v49 = vadd.f32 %v424_v48, %v356_v47  ;;  %v617_v50 = vpop.f32.mrb[1].mxu1 }
 0x1d4   :  { %v429_v51 = vmul.f32 1.442695, %v425_v49  ;;  %vm428_vm4 = vcmp.gt.f32.partialorder %v425_v49, 20.0 }
 0x1d6   :  { %650 = vpow2.f32 %v429_v51 }
 0x1e0   :  { %v651_v52 = vpop.eup %650 }
 0x1e1   :  { %v431_v53 = vadd.f32 1.0, %v651_v52  ;;  %v434_v55 = vmul.f32 -0.5, %v651_v52  ;;  %v437_v58 = vand.u32 2147483647, %v651_v52 }
 0x1e3   :  { %652 = vlog2.f32 %v431_v53  ;;  %v435_v35 = vadd.f32 1.0, %v434_v55  ;;  %vm438_vm3 = vcmp.lt.f32.partialorder %v437_v58, 0.0004427343 }
 0x1e5   :  { %v436_v62 = vmul.f32 %v651_v52, %v435_v35 }
 0x1ed   :  { %v653_v60 = vpop.eup %652 }
 0x1ee   :  { %v433_v61 = vmul.f32 0.6931472, %v653_v60 }
 0x1f0   :  { %v439_v0 = vsel %vm438_vm3, %v436_v62, %v433_v61 }
 0x1f1   :  { %v440_v1 = vsel %vm428_vm4, %v425_v49, %v439_v0 }
 0x1f2   :  { %v448_v2 = vmul.f32 %v446_v63, %v440_v1 }
 0x1f4   :  { %v450_v3 = vrot.slane %v448_v2, 1 }
 0x1f6   :  { %v452_v4 = vadd.f32 %v450_v3, %v425_v49 }
 0x1f8   :  { %654 = vtanh.f32 %v452_v4 }
 0x1f9   :  { %656 = vlog2.f32 %v440_v1 }
 0x202   :  { %v655_v5 = vpop.eup %654 }
 0x203   :  { %658 = vtanh.f32 %v655_v5  ;;  %v657_v9 = vpop.eup %656  ;;  %v484_v26 = vmul.f32 2.0, %v655_v5 }
 0x204   :  { %v457_v10 = vmul.f32 0.6931472, %v657_v9 }
 0x206   :  { %v465_v14 = vrot.slane %v457_v10, %v464_v11 }
 0x208   :  { %v466_v18 = vcombine.high %v465_v14, %v465_v14 }
 0x20a   :  { %v473_v20 = vrot.slane %v466_v18, %v464_v11 }
 0x20c   :  { %v475_v21 = vsub.f32 %v455_v19, %v473_v20 }
 0x20d   :  { %v659_v12 = vpop.eup %658 }
 0x20e   :  { %v478_v13 = vmul.f32 %v659_v12, %v659_v12  ;;  %v522_v23 = vadd.f32 -0.9189385, %v475_v21 }
 0x210   :  { %v479_v15 = vsub.f32 1.0, %v478_v13 }
 0x212   :  { %v480_v16 = vadd.f32 1e-07, %v479_v15 }
 0x214   :  { %660 = vlog2.f32 %v480_v16 }
 0x21e   :  { %v661_v22 = vpop.eup %660 }
 0x21f   :  { %v482_v24 = vmul.f32 0.6931472, %v661_v22 }
 0x221   :  { %v483_v25 = vsub.f32 %v482_v24, %v522_v23 }
 0x223   :  { %v486_v27 = vrot.slane %v483_v25, 7 }
 0x225   :  { %v489_v28 = vsel %vm488_vm5, %v484_v26, %v486_v27 }
 0x226   :  { %490 = vst [vmem:[#allocation2] sm:$0x3] %v489_v28 }
 0x227   :  { %673 = shalt.err (!%p670_p4)
}
 0x228   :  { %s674_s18 = scalar_lea.hbm %s877_s6, 32 }
 0x229   :  { %p675_p5 = scmp.ne.s32.totalorder %s877_s6, %s674_s18  ;;  %p678_p6 = scmp.lt.u32.totalorder %s674_s18, %s877_s6 }
 0x22b   :  { %p680_p7 = pnand %p678_p6, %p675_p5 }
 0x22d   :  { %683 = shalt.err (!%p680_p7)
}
 0x22e   :  { %500 = dma.vmem_to_hbm [thread:$0]  %s498_s5, 32, %s877_s6, [#allocation3]  }
 0x22f   :  { %684 = dma.done.wait [#allocation3], 32  }
 0x230   :  { %685 = vsyncadd [#allocation3], 4294967264 }
 0x231   :  { %504 = vsyncpa [#allocation3], 1 }

</bundles_post_ra>
